<compile_context>
chip_gen: v7x
topology: tpu7x:2x2x1
jax: 0.10.0
libtpu: 0.0.40
codegen_flags: <defaults>
</compile_context>

<pallas_src>
import jax
import jax.numpy as jnp
from jax.experimental import pallas as pl
from jax.experimental.pallas import tpu as pltpu


def _round_up(x, m):
    return ((x + m - 1) // m) * m


def _pick_tile(total, target, quantum):
    """Largest multiple of `quantum` <= target that evenly divides `total`
    (fallback only; prepare_lex_decoder_params pads V so this rarely triggers)."""
    if total <= target:
        return total
    t = (target // quantum) * quantum
    while t > quantum and total % t != 0:
        t -= quantum
    return max(t, quantum)


def _spec(shape, index_map, buffers=None):
    """BlockSpec with optional explicit buffer count; falls back cleanly if the
    installed JAX does not support pipeline_mode."""
    if buffers is None:
        return pl.BlockSpec(shape, index_map)
    try:
        return pl.BlockSpec(shape, index_map, pipeline_mode=pl.Buffered(buffers))
    except TypeError:
        return pl.BlockSpec(shape, index_map)


def _lex_decoder_kernel(x_ref, w1_ref, b1_ref, w2_ref, b2_ref, out_ref, h_ref):
    # x_ref  : (tm, Hp)   row tile of flattened hidden_states (compute dtype)
    # w1_ref : (Hp, Hp)   transform weight, (in, out) layout (compute dtype)
    # b1_ref : (1, Hp)    transform bias (f32)
    # w2_ref : (Hp, tn)   fc-weight vocab slab, (in, out) layout (compute dtype)
    # b2_ref : (1, tn)    fc-bias vocab slab (f32)
    # out_ref: (tm, tn)   logits tile
    # h_ref  : (tm, Hp)   VMEM scratch caching transformed hidden states (compute dtype)
    j = pl.program_id(1)  # vocab-tile index (innermost grid axis)

    @pl.when(j == 0)
    def _():
        # Transform matmul: computed once per row tile, reused for every vocab tile.
        x = x_ref[...].astype(w1_ref.dtype)  # no-op; wrapper already casts
        h = jnp.dot(x, w1_ref[...], preferred_element_type=jnp.float32)
        h = h + b1_ref[...]                  # bias added in the f32 accumulator
        # Dropout: identity in eval/inference mode.
        h_ref[...] = h.astype(h_ref.dtype)   # single dtype for both MXU passes

    logits = jnp.dot(h_ref[...], w2_ref[...], preferred_element_type=jnp.float32)
    out_ref[...] = (logits + b2_ref[...]).astype(out_ref.dtype)


def prepare_lex_decoder_params(w_t, b_t, w_fc, b_fc, *, param_dtype=None, tn=1024):
    """One-time conversion of PyTorch-layout parameters for the kernel.

    Call ONCE at parameter-load time (NOT per forward step):
      * transposes (out, in) -> (in, out),
      * pads H up to a multiple of 128 (lane-dense x / h / w1 tiles),
      * pads V up to a multiple of 128, and further to a multiple of `tn` when
        V exceeds `tn`, so the fc-weight slab / output stores stay large,
      * optionally casts weights (param_dtype=jnp.bfloat16 for the MXU fast path).

    Returns (w1, b1, w2, b2, vocab_size).
    """
    if param_dtype is None:
        param_dtype = w_t.dtype
    V, H = w_fc.shape
    H_pad = _round_up(H, 128)
    V_pad = _round_up(V, 128)
    if V_pad > tn:
        V_pad = _round_up(V, tn)

    w1 = jnp.asarray(w_t, param_dtype).T                   # (H, H)   in x out
    w2 = jnp.asarray(w_fc, param_dtype).T                  # (H, V)   in x out
    b1 = jnp.asarray(b_t, jnp.float32).reshape(1, H)
    b2 = jnp.asarray(b_fc, jnp.float32).reshape(1, V)

    if H_pad != H:
        dh = H_pad - H
        w1 = jnp.pad(w1, ((0, dh), (0, dh)))
        b1 = jnp.pad(b1, ((0, 0), (0, dh)))
        w2 = jnp.pad(w2, ((0, dh), (0, 0)))
    if V_pad != V:
        dv = V_pad - V
        w2 = jnp.pad(w2, ((0, 0), (0, dv)))
        b2 = jnp.pad(b2, ((0, 0), (0, dv)))
    return w1, b1, w2, b2, V


def lex_decoder_forward(hidden_states, w1, b1, w2, b2, vocab_size=None,
                        *, tm=512, tn=1024, out_dtype=None, vmem_limit_bytes=None):
    """
    hidden_states: (B, S, H)
    w1: (Hp, Hp)     transform weight, (in, out) layout, H padded to x128
    b1: (1, Hp)      transform bias (f32)
    w2: (Hp, Vp)     fc weight, (in, out) layout, H/V padded
    b2: (1, Vp)      fc bias (f32), vocab padded
    vocab_size: true (unpadded) vocab size; defaults to w2.shape[1]
    tm/tn: row / vocab tile sizes (tm=512, tn=1024 keep the fc matmul
           compute-bound on v5e/v6e/v7x with bf16 weights; shrink only if the
           computed VMEM budget exceeds the chip).
    out_dtype: logits dtype (default: activation dtype). Pass jnp.bfloat16 to
           halve the logits writeback when downstream softmax/argmax allows.
    vmem_limit_bytes: override the automatically computed scoped-VMEM budget.
    returns logits: (B, S, vocab_size)
    """
    B, S, H = hidden_states.shape
    H_pad = w1.shape[0]
    V_pad = w2.shape[1]
    if vocab_size is None:
        vocab_size = V_pad
    compute_dtype = w1.dtype
    if out_dtype is None:
        out_dtype = hidden_states.dtype
    c_item = jnp.dtype(compute_dtype).itemsize
    o_item = jnp.dtype(out_dtype).itemsize
    M = B * S

    # Row tiling: align to the native sublane quantum of the compute dtype.
    sub = 16 if c_item == 2 else 8
    tm_eff = _round_up(min(tm, _round_up(M, sub)), sub)
    M_pad = _round_up(M, tm_eff)

    # Single MXU dtype: cast activations to the weight dtype once (also halves
    # the x HBM read when weights are bf16).
    x2d = hidden_states.reshape(M, H).astype(compute_dtype)
    if M_pad != M or H_pad != H:
        x2d = jnp.pad(x2d, ((0, M_pad - M), (0, H_pad - H)))

    # Vocab tiling: V_pad is prepared as a multiple of tn (or <= tn), so tn stays large.
    if V_pad <= tn:
        tn_eff = V_pad
    elif V_pad % tn == 0:
        tn_eff = tn
    else:
        tn_eff = _pick_tile(V_pad, tn, 128)   # fallback for mismatched prep/tn

    grid = (M_pad // tm_eff, V_pad // tn_eff)
    num_row_tiles = grid[0]

    # Explicit scoped-VMEM budget: 2x x tile + 1x resident w1/b1 + 3x fc slab
    # + 2x b2 slab + 2x output tile + h scratch + headroom, capped below physical.
    if vmem_limit_bytes is None:
        vmem_limit_bytes = int(
            2 * tm_eff * H_pad * c_item
            + 1 * H_pad * H_pad * c_item
            + 1 * H_pad * 4
            + 3 * H_pad * tn_eff * c_item
            + 2 * tn_eff * 4
            + 2 * tm_eff * tn_eff * o_item
            + tm_eff * H_pad * c_item
            + (8 << 20)
        )
        try:
            cap = int(pltpu.get_tpu_info().vmem_capacity_bytes * 0.8)
        except Exception:
            cap = 100 << 20
        vmem_limit_bytes = min(vmem_limit_bytes, cap)

    # Accurate HBM/FLOP estimate: fc weight is re-streamed once per row tile;
    # logits writeback counted in the true output dtype.
    cost = pl.CostEstimate(
        flops=2 * M_pad * H_pad * H_pad + 2 * M_pad * H_pad * V_pad,
        transcendentals=0,
        bytes_accessed=int(
            M_pad * H_pad * c_item
            + H_pad * H_pad * c_item
            + num_row_tiles * H_pad * V_pad * c_item
            + H_pad * 4 + num_row_tiles * V_pad * 4
            + M_pad * V_pad * o_item
        ),
    )

    # Only request a 3rd fc-slab buffer when there are enough vocab tiles for it.
    w2_buffers = 3 if grid[1] >= 3 else None

    out = pl.pallas_call(
        _lex_decoder_kernel,
        out_shape=jax.ShapeDtypeStruct((M_pad, V_pad), out_dtype),
        grid_spec=pltpu.PrefetchScalarGridSpec(
            num_scalar_prefetch=0,
            grid=grid,
            in_specs=[
                pl.BlockSpec((tm_eff, H_pad), lambda i, j: (i, 0)),        # x row tile
                _spec((H_pad, H_pad), lambda i, j: (0, 0), buffers=1),     # w1 (resident)
                _spec((1, H_pad), lambda i, j: (0, 0), buffers=1),         # b1 (resident)
                _spec((H_pad, tn_eff), lambda i, j: (0, j), buffers=w2_buffers),  # fc slab
                pl.BlockSpec((1, tn_eff), lambda i, j: (0, j)),            # fc bias slab
            ],
            out_specs=pl.BlockSpec((tm_eff, tn_eff), lambda i, j: (i, j)),
            scratch_shapes=[pltpu.VMEM((tm_eff, H_pad), compute_dtype)],   # cached h
        ),
        compiler_params=pltpu.CompilerParams(
            dimension_semantics=("parallel", "arbitrary"),
            vmem_limit_bytes=vmem_limit_bytes,
        ),
        cost_estimate=cost,
    )(x2d, w1, b1, w2, b2)

    return out[:M, :vocab_size].reshape(B, S, vocab_size)


if __name__ == "__main__":
    # Small shapes consistent with the module: batch=2, seq=8, hidden=32, vocab=64.
    B, S, H, V = 2, 8, 32, 64
    key = jax.random.PRNGKey(0)
    k_x, k_w1, k_b1, k_w2, k_b2 = jax.random.split(key, 5)

    hidden_states = jax.random.normal(k_x, (B, S, H), dtype=jnp.float32)
    # PyTorch nn.Linear layout: weight (out, in), bias (out,)
    w_t = jax.random.uniform(k_w1, (H, H), jnp.float32, -0.1, 0.1)
    b_t = jax.random.uniform(k_b1, (H,), jnp.float32, -0.1, 0.1)
    w_fc = jax.random.uniform(k_w2, (V, H), jnp.float32, -0.1, 0.1)
    b_fc = jax.random.uniform(k_b2, (V,), jnp.float32, -0.1, 0.1)

    # Reference in plain JAX (eval-mode dropout = identity).
    ref = (hidden_states @ w_t.T + b_t) @ w_fc.T + b_fc

    # f32 parameter path.
    w1, b1, w2, b2, vocab = prepare_lex_decoder_params(w_t, b_t, w_fc, b_fc)
    logits = lex_decoder_forward(hidden_states, w1, b1, w2, b2, vocab)
    logits = jax.block_until_ready(logits)
    assert logits.shape == (B, S, V)
    assert jnp.allclose(logits, ref, atol=1e-4, rtol=1e-4)

    # bf16 parameter path (MXU fast path); mixed-precision tolerance.
    w1b, b1b, w2b, b2b, vocab = prepare_lex_decoder_params(
        w_t, b_t, w_fc, b_fc, param_dtype=jnp.bfloat16)
    logits_bf16 = lex_decoder_forward(hidden_states, w1b, b1b, w2b, b2b, vocab)
    logits_bf16 = jax.block_until_ready(logits_bf16)
    assert logits_bf16.shape == (B, S, V)
    assert jnp.allclose(logits_bf16.astype(jnp.float32), ref, atol=5e-2, rtol=5e-2)

    print("KERNEL_OK")
</pallas_src>

<mosaic_0001>
module attributes {stable_mosaic.version = 11 : i64} {
  func.func @_lex_decoder_kernel(%arg0: i32, %arg1: i32, %arg2: memref<16x128xf32, #tpu.memory_space<vmem>>, %arg3: memref<128x128xf32, #tpu.memory_space<vmem>>, %arg4: memref<1x128xf32, #tpu.memory_space<vmem>>, %arg5: memref<128x128xf32, #tpu.memory_space<vmem>>, %arg6: memref<1x128xf32, #tpu.memory_space<vmem>>, %arg7: memref<16x128xf32, #tpu.memory_space<vmem>>, %arg8: memref<16x128xf32, #tpu.memory_space<vmem>>) attributes {dimension_semantics = [#tpu.dimension_semantics<parallel>, #tpu.dimension_semantics<arbitrary>], iteration_bounds = array<i64: 1, 1>, scalar_prefetch = 0 : i64, scratch_operands = 1 : i64, tpu.core_type = #tpu.core_type<tc>, window_params = [{transform_indices = @transform_0, window_bounds = array<i64: 16, 128>}, {pipeline_mode = #tpu.pipeline_mode<synchronous>, transform_indices = @transform_1, window_bounds = array<i64: 128, 128>}, {pipeline_mode = #tpu.pipeline_mode<synchronous>, transform_indices = @transform_2, window_bounds = array<i64: 1, 128>}, {transform_indices = @transform_3, window_bounds = array<i64: 128, 128>}, {transform_indices = @transform_4, window_bounds = array<i64: 1, 128>}, {transform_indices = @transform_5, window_bounds = array<i64: 16, 128>}]} {
    %c0_i32 = arith.constant 0 : i32
    %0 = arith.cmpi eq, %arg1, %c0_i32 : i32
    %1 = arith.extui %0 : i1 to i32
    %c0_i32_0 = arith.constant 0 : i32
    %2 = arith.cmpi ne, %1, %c0_i32_0 : i32
    scf.if %2 {
      %c0_8 = arith.constant 0 : index
      %c0_9 = arith.constant 0 : index
      %10 = vector.load %arg2[%c0_8, %c0_9] : memref<16x128xf32, #tpu.memory_space<vmem>>, vector<16x128xf32>
      %c0_10 = arith.constant 0 : index
      %c0_11 = arith.constant 0 : index
      %11 = vector.load %arg3[%c0_10, %c0_11] : memref<128x128xf32, #tpu.memory_space<vmem>>, vector<128x128xf32>
      %cst_12 = arith.constant dense<0.000000e+00> : vector<16x128xf32>
      %12 = tpu.matmul %10, %11, %cst_12 {dimension_numbers = #tpu.dot_dimension_numbers<[1], [0], [0], [1], [0, 0, 1, 1], [], []>} : vector<16x128xf32>, vector<128x128xf32>, vector<16x128xf32> -> vector<16x128xf32>
      %c0_13 = arith.constant 0 : index
      %c0_14 = arith.constant 0 : index
      %13 = vector.load %arg4[%c0_13, %c0_14] : memref<1x128xf32, #tpu.memory_space<vmem>>, vector<1x128xf32>
      %14 = vector.broadcast %13 : vector<1x128xf32> to vector<16x128xf32>
      %15 = arith.addf %12, %14 : vector<16x128xf32>
      %c0_15 = arith.constant 0 : index
      %c0_16 = arith.constant 0 : index
      %16 = vector.load %arg8[%c0_15, %c0_16] : memref<16x128xf32, #tpu.memory_space<vmem>>, vector<16x128xf32>
      tpu.vector_store %arg8[%c0_15, %c0_16], %15 {strides = array<i32>} : memref<16x128xf32, #tpu.memory_space<vmem>>, vector<16x128xf32>,
    } else {
    }
    %c0 = arith.constant 0 : index
    %c0_1 = arith.constant 0 : index
    %3 = vector.load %arg8[%c0, %c0_1] : memref<16x128xf32, #tpu.memory_space<vmem>>, vector<16x128xf32>
    %c0_2 = arith.constant 0 : index
    %c0_3 = arith.constant 0 : index
    %4 = vector.load %arg5[%c0_2, %c0_3] : memref<128x128xf32, #tpu.memory_space<vmem>>, vector<128x128xf32>
    %cst = arith.constant dense<0.000000e+00> : vector<16x128xf32>
    %5 = tpu.matmul %3, %4, %cst {dimension_numbers = #tpu.dot_dimension_numbers<[1], [0], [0], [1], [0, 0, 1, 1], [], []>} : vector<16x128xf32>, vector<128x128xf32>, vector<16x128xf32> -> vector<16x128xf32>
    %c0_4 = arith.constant 0 : index
    %c0_5 = arith.constant 0 : index
    %6 = vector.load %arg6[%c0_4, %c0_5] : memref<1x128xf32, #tpu.memory_space<vmem>>, vector<1x128xf32>
    %7 = vector.broadcast %6 : vector<1x128xf32> to vector<16x128xf32>
    %8 = arith.addf %5, %7 : vector<16x128xf32>
    %c0_6 = arith.constant 0 : index
    %c0_7 = arith.constant 0 : index
    %9 = vector.load %arg7[%c0_6, %c0_7] : memref<16x128xf32, #tpu.memory_space<vmem>>, vector<16x128xf32>
    tpu.vector_store %arg7[%c0_6, %c0_7], %8 {strides = array<i32>} : memref<16x128xf32, #tpu.memory_space<vmem>>, vector<16x128xf32>,
    return
  }
  func.func @transform_0(%arg0: i32, %arg1: i32) -> (i32, i32) {
    %c0_i32 = arith.constant 0 : i32
    %c0_i32_0 = arith.constant 0 : i32
    return %arg0, %c0_i32 : i32, i32
  }
  func.func @transform_1(%arg0: i32, %arg1: i32) -> (i32, i32) {
    %c0_i32 = arith.constant 0 : i32
    %c0_i32_0 = arith.constant 0 : i32
    %c0_i32_1 = arith.constant 0 : i32
    return %c0_i32, %c0_i32_0 : i32, i32
  }
  func.func @transform_2(%arg0: i32, %arg1: i32) -> (i32, i32) {
    %c0_i32 = arith.constant 0 : i32
    %c0_i32_0 = arith.constant 0 : i32
    %c0_i32_1 = arith.constant 0 : i32
    return %c0_i32, %c0_i32_0 : i32, i32
  }
  func.func @transform_3(%arg0: i32, %arg1: i32) -> (i32, i32) {
    %c0_i32 = arith.constant 0 : i32
    %c0_i32_0 = arith.constant 0 : i32
    return %c0_i32, %arg1 : i32, i32
  }
  func.func @transform_4(%arg0: i32, %arg1: i32) -> (i32, i32) {
    %c0_i32 = arith.constant 0 : i32
    %c0_i32_0 = arith.constant 0 : i32
    return %c0_i32, %arg1 : i32, i32
  }
  func.func @transform_5(%arg0: i32, %arg1: i32) -> (i32, i32) {
    %c0_i32 = arith.constant 0 : i32
    return %arg0, %arg1 : i32, i32
  }
}

</mosaic_0001>

<bundles_post_ra>
// kernel: tpu_custom_call.1
= control target key start
LH: loop header
LB: loop body
LE: loop exit
PB: predicated region body
PF: predicated region fallthrough
CT: control target
= control target key end

     0   :  { %10 = vsyncpa [#allocation4], 0  ;;  %s669_s0 = inlined_call_operand.hbm [shape: f32[16,128], index: 0, kind: input, shape index: {}]   ;;  %s670_s1 = inlined_call_operand.hbm [shape: f32[128,128], index: 1, kind: input, shape index: {}]   ;;  %s671_s2 = inlined_call_operand.vmem [shape: f32[1,128], index: 2, kind: input, shape index: {}]   ;;  %s672_s3 = inlined_call_operand.hbm [shape: f32[128,128], index: 3, kind: input, shape index: {}]   ;;  %s673_s4 = inlined_call_operand.vmem [shape: f32[1,128], index: 4, kind: input, shape index: {}]   ;;  %s674_s5 = inlined_call_operand.hbm [shape: f32[16,128], index: 5, kind: output, shape index: {}]  }
   0x1   :  { %11 = vsyncpa [#allocation7], 0 }
   0x2   :  { %12 = vsyncpa [#allocation5], 0  ;;  %s560_s18 = smov [#allocation6]   ;;  %s561_s20 = smov [#allocation3]  }
   0x3   :  { %s30_s19 = sshll.u32 %s560_s18, 4  ;;  %s18_s21 = sshll.u32 %s561_s20, 4  ;;  %s31_s19 = int_to_ptr.vmem [resolvable:$true] %s30_s19  ;;  %s596_s21 = int_to_ptr.vmem [resolvable:$true] %s18_s21 }
   0x4   :  { %s466_s24 = scalar_lea.hbm %s670_s1, 2048 }
   0x5   :  { %p467_p0 = scmp.ne.s32.totalorder %s670_s1, %s466_s24  ;;  %p470_p1 = scmp.lt.u32.totalorder %s466_s24, %s670_s1 }
   0x7   :  { %p472_p2 = pnand %p470_p1, %p467_p0 }
   0x9   :  { %475 = shalt.err (!%p472_p2)
}
   0xa   :  { %s476_s29 = scalar_lea.vmem %s31_s19, 2048  ;;  %p481_p4 = scmp.lt.s32.totalorder %s31_s19, %s31_s19 }
   0xb   :  { %p477_p3 = scmp.ne.s32.totalorder %s31_s19, %s476_s29  ;;  %p482_p5 = scmp.lt.s32.totalorder %s476_s29, %s476_s29 }
   0xd   :  { %p483_p6 = por %p482_p5, %p481_p4 }
   0xf   :  { %p484_p7 = pnand %p483_p6, %p477_p3 }
  0x11   :  { %487 = shalt.err (!%p484_p7)
}
  0x12   :  { %s562_s30 = smov 128   ;;  %s563_s6 = smov 8  }
  0x13   :  { %36 = dma.hbm_to_vmem [thread:$0]  %s670_s1, 2048, %s31_s19, [#allocation7], %s562_s30, %s562_s30, %s563_s6  }
  0x14   :  { %s488_s11 = scalar_lea.hbm %s669_s0, 256 }
  0x15   :  { %p489_p8 = scmp.ne.s32.totalorder %s669_s0, %s488_s11  ;;  %p492_p9 = scmp.lt.u32.totalorder %s488_s11, %s669_s0 }
  0x17   :  { %p494_p10 = pnand %p492_p9, %p489_p8 }
  0x19   :  { %497 = shalt.err (!%p494_p10)
}
  0x1a   :  { %s498_s16 = scalar_lea.vmem %s596_s21, 256  ;;  %p503_p12 = scmp.lt.s32.totalorder %s596_s21, %s596_s21 }
  0x1b   :  { %p499_p11 = scmp.ne.s32.totalorder %s596_s21, %s498_s16  ;;  %p504_p13 = scmp.lt.s32.totalorder %s498_s16, %s498_s16 }
  0x1d   :  { %p505_p0 = por %p504_p13, %p503_p12 }
  0x1f   :  { %p506_p1 = pnand %p505_p0, %p499_p11 }
  0x21   :  { %509 = shalt.err (!%p506_p1)
}
  0x22   :  { %24 = dma.hbm_to_vmem [thread:$0]  %s669_s0, 256, %s596_s21, [#allocation4], %s562_s30, %s562_s30, %s563_s6  }
  0x23   :  { %s564_s18 = smov [#allocation8]   ;;  %s510_s23 = scalar_lea.hbm %s672_s3, 2048 }
  0x24   :  { %s44_s19 = sshll.u32 %s564_s18, 4  ;;  %p511_p2 = scmp.ne.s32.totalorder %s672_s3, %s510_s23  ;;  %s45_s19 = int_to_ptr.vmem [resolvable:$true] %s44_s19 }
  0x25   :  { %p514_p3 = scmp.lt.u32.totalorder %s510_s23, %s672_s3 }
  0x27   :  { %p516_p4 = pnand %p514_p3, %p511_p2 }
  0x29   :  { %519 = shalt.err (!%p516_p4)
}
  0x2a   :  { %s520_s28 = scalar_lea.vmem %s45_s19, 2048  ;;  %p525_p6 = scmp.lt.s32.totalorder %s45_s19, %s45_s19 }
  0x2b   :  { %p521_p5 = scmp.ne.s32.totalorder %s45_s19, %s520_s28  ;;  %p526_p7 = scmp.lt.s32.totalorder %s520_s28, %s520_s28 }
  0x2d   :  { %p527_p8 = por %p526_p7, %p525_p6 }
  0x2f   :  { %p528_p9 = pnand %p527_p8, %p521_p5 }
  0x31   :  { %531 = shalt.err (!%p528_p9)
}
  0x32   :  { %50 = dma.hbm_to_vmem [thread:$0]  %s672_s3, 2048, %s45_s19, [#allocation7], %s562_s30, %s562_s30, %s563_s6  }
  0x33   :  { %554 = dma.done.wait [#allocation4], 256  }
  0x34   :  { %555 = vsyncadd [#allocation4], 4294967040 }
  0x35   :  { %556 = dma.done.wait [#allocation7], 4096  }
  0x36   :  { %557 = vsyncadd [#allocation7], 4294963200  ;;  %v68_v0 = vld [vmem:[#allocation6] sm:$0xff]  ;;  %v69_v1 = vld [vmem:[#allocation6 + $0x8] sm:$0xff]  ;;  %s565_s9 = smov [#allocation9]  }
  0x37   :  { %v70_v2 = vld [vmem:[#allocation6 + $0x10] sm:$0xff]  ;;  %v396_v3 = vpack.c.bf16 %v69_v1, %v68_v0  ;;  %v71_v4 = vld [vmem:[#allocation6 + $0x18] sm:$0xff]  ;;  %v72_v6 = vld [vmem:[#allocation6 + $0x20] sm:$0xff]  ;;  %s275_s10 = sshll.u32 %s565_s9, 4  ;;  %s276_s10 = int_to_ptr.vmem [resolvable:$true] %s275_s10 }
  0x38   :  { %v400_v5 = vpack.c.bf16 %v71_v4, %v70_v2  ;;  %v73_v7 = vld [vmem:[#allocation6 + $0x28] sm:$0xff]  ;;  %v74_v9 = vld [vmem:[#allocation6 + $0x30] sm:$0xff]  ;;  %v75_v10 = vld [vmem:[#allocation6 + $0x38] sm:$0xff]  ;;  %p537_p11 = scmp.lt.s32.totalorder %s276_s10, %s276_s10 }
  0x39   :  { %397 = vmatprep.subr.bf16.mxu0 %v396_v3  ;;  %v404_v8 = vpack.c.bf16 %v73_v7, %v72_v6  ;;  %v66_v11 = vld [vmem:[#allocation3] sm:$0xff]  ;;  %v170_v12 = vld [vmem:[#allocation8] sm:$0xff]  ;;  %v171_v13 = vld [vmem:[#allocation8 + $0x8] sm:$0xff]  ;;  %v408_v20 = vpack.c.bf16 %v75_v10, %v74_v9 }
  0x3a   :  { %399 = vmatpush3.bf16.msra.mxu0 %v396_v3  ;;  %358 = vmatprep.mubr.f32.mxu0 %v66_v11  ;;  %v172_v14 = vld [vmem:[#allocation8 + $0x10] sm:$0xff]  ;;  %v428_v15 = vpack.c.bf16 %v171_v13, %v170_v12  ;;  %v173_v16 = vld [vmem:[#allocation8 + $0x18] sm:$0xff]  ;;  %v174_v18 = vld [vmem:[#allocation8 + $0x20] sm:$0xff] }
  0x3b   :  { %401 = vmatprep.subr.bf16.mxu0 %v400_v5  ;;  %v432_v17 = vpack.c.bf16 %v173_v16, %v172_v14  ;;  %v175_v19 = vld [vmem:[#allocation8 + $0x28] sm:$0xff]  ;;  %v76_v21 = vld [vmem:[#allocation6 + $0x40] sm:$0xff]  ;;  %v176_v24 = vld [vmem:[#allocation8 + $0x30] sm:$0xff] }
  0x3c   :  { %429 = vmatprep.subr.bf16.mxu1 %v428_v15  ;;  %v77_v22 = vld [vmem:[#allocation6 + $0x48] sm:$0xff]  ;;  %v436_v23 = vpack.c.bf16 %v175_v19, %v174_v18  ;;  %v177_v25 = vld [vmem:[#allocation8 + $0x38] sm:$0xff]  ;;  %v78_v27 = vld [vmem:[#allocation6 + $0x50] sm:$0xff] }
  0x3d   :  { %431 = vmatpush3.bf16.msra.mxu1 %v428_v15  ;;  %v412_v26 = vpack.c.bf16 %v77_v22, %v76_v21  ;;  %v79_v28 = vld [vmem:[#allocation6 + $0x58] sm:$0xff]  ;;  %v440_v29 = vpack.c.bf16 %v177_v25, %v176_v24  ;;  %v178_v30 = vld [vmem:[#allocation8 + $0x40] sm:$0xff]  ;;  %v179_v31 = vld [vmem:[#allocation8 + $0x48] sm:$0xff] }
  0x3e   :  { %403 = vmatpush3.bf16.msra.mxu0 %v400_v5  ;;  %433 = vmatprep.subr.bf16.mxu1 %v432_v17  ;;  %v416_v32 = vpack.c.bf16 %v79_v28, %v78_v27  ;;  %v80_v33 = vld [vmem:[#allocation6 + $0x60] sm:$0xff]  ;;  %v81_v34 = vld [vmem:[#allocation6 + $0x68] sm:$0xff]  ;;  %v444_v35 = vpack.c.bf16 %v179_v31, %v178_v30  ;;  %v180_v36 = vld [vmem:[#allocation8 + $0x50] sm:$0xff] }
  0x3f   :  { %405 = vmatprep.subr.bf16.mxu0 %v404_v8  ;;  %v181_v37 = vld [vmem:[#allocation8 + $0x58] sm:$0xff]  ;;  %v420_v38 = vpack.c.bf16 %v81_v34, %v80_v33  ;;  %v82_v39 = vld [vmem:[#allocation6 + $0x70] sm:$0xff]  ;;  %v182_v42 = vld [vmem:[#allocation8 + $0x60] sm:$0xff] }
  0x40   :  { %v83_v40 = vld [vmem:[#allocation6 + $0x78] sm:$0xff]  ;;  %v448_v41 = vpack.c.bf16 %v181_v37, %v180_v36  ;;  %v183_v43 = vld [vmem:[#allocation8 + $0x68] sm:$0xff]  ;;  %v184_v47 = vld [vmem:[#allocation8 + $0x70] sm:$0xff] }
  0x41   :  { %435 = vmatpush3.bf16.msra.mxu1 %v432_v17  ;;  %v424_v44 = vpack.c.bf16 %v83_v40, %v82_v39  ;;  %v452_v45 = vpack.c.bf16 %v183_v43, %v182_v42  ;;  %v67_v46 = vld [vmem:[#allocation3 + $0x8] sm:$0xff]  ;;  %v288_v50 = vld [vmem:[%s671_s2] ss:$0 sm:$0xff]  ;;  %s532_s2 = scalar_lea.vmem %s276_s10, 256 }
  0x42   :  { %407 = vmatpush3.bf16.msra.mxu0 %v404_v8  ;;  %437 = vmatprep.subr.bf16.mxu1 %v436_v23  ;;  %v185_v48 = vld [vmem:[#allocation8 + $0x78] sm:$0xff]  ;;  %v289_v55 = vld [vmem:[%s673_s4] ss:$0 sm:$0xff]  ;;  %p533_p10 = scmp.ne.s32.totalorder %s276_s10, %s532_s2  ;;  %p538_p12 = scmp.lt.s32.totalorder %s532_s2, %s532_s2 }
  0x43   :  { %409 = vmatprep.subr.bf16.mxu0 %v408_v20  ;;  %v456_v49 = vpack.c.bf16 %v185_v48, %v184_v47 }
  0x44   :  { %p539_p13 = por %p538_p12, %p537_p11 }
  0x45   :  { %439 = vmatpush3.bf16.msra.mxu1 %v436_v23 }
  0x46   :  { %411 = vmatpush3.bf16.msra.mxu0 %v408_v20  ;;  %441 = vmatprep.subr.bf16.mxu1 %v440_v29  ;;  %p540_p0 = pnand %p539_p13, %p533_p10 }
  0x47   :  { %413 = vmatprep.subr.bf16.mxu0 %v412_v26 }
  0x49   :  { %443 = vmatpush3.bf16.msra.mxu1 %v440_v29 }
  0x4a   :  { %415 = vmatpush3.bf16.msra.mxu0 %v412_v26  ;;  %445 = vmatprep.subr.bf16.mxu1 %v444_v35 }
  0x4b   :  { %417 = vmatprep.subr.bf16.mxu0 %v416_v32 }
  0x4d   :  { %447 = vmatpush3.bf16.msra.mxu1 %v444_v35 }
  0x4e   :  { %419 = vmatpush3.bf16.msra.mxu0 %v416_v32  ;;  %449 = vmatprep.subr.bf16.mxu1 %v448_v41 }
  0x4f   :  { %421 = vmatprep.subr.bf16.mxu0 %v420_v38 }
  0x51   :  { %451 = vmatpush3.bf16.msra.mxu1 %v448_v41 }
  0x52   :  { %423 = vmatpush3.bf16.msra.mxu0 %v420_v38  ;;  %453 = vmatprep.subr.bf16.mxu1 %v452_v45 }
  0x53   :  { %425 = vmatprep.subr.bf16.mxu0 %v424_v44 }
  0x55   :  { %455 = vmatpush3.bf16.msra.mxu1 %v452_v45 }
  0x56   :  { %427 = vmatpush3.bf16.msra.mxu0 %v424_v44  ;;  %457 = vmatprep.subr.bf16.mxu1 %v456_v49 }
  0x59   :  { %359 = vmatmul.mubr.f32.vlgmr.msra.gmra.mrb[0].mxu0 %v67_v46  ;;  %459 = vmatpush3.bf16.msra.mxu1 %v456_v49 }
 0x12c   :  { %v360_v51 = vpop.f32.mrb[0].mxu0 }
 0x12d   :  { %v157_v52 = vpop.f32.mrb[1].mxu0  ;;  %v163_v54 = vadd.f32 %v360_v51, %v288_v50 }
 0x12e   :  { %v158_v53 = vadd.f32 %v288_v50, %v157_v52 }
 0x130   :  { %393 = vmatprep.mubr.f32.mxu1 %v158_v53 }
 0x131   :  { %394 = vmatmul.mubr.f32.vlgmr.msra.gmra.mrb[0].mxu1 %v163_v54 }
 0x204   :  { %v395_v56 = vpop.f32.mrb[0].mxu1 }
 0x205   :  { %v265_v57 = vadd.f32 %v395_v56, %v289_v55  ;;  %v259_v58 = vpop.f32.mrb[1].mxu1 }
 0x206   :  { %v260_v59 = vadd.f32 %v289_v55, %v259_v58 }
 0x207   :  { %269 = vst [vmem:[#allocation9 + $0x8] sm:$0xff] %v265_v57 }
 0x208   :  { %268 = vst [vmem:[#allocation9] sm:$0xff] %v260_v59 }
 0x209   :  { %543 = shalt.err (!%p540_p0)
}
 0x20a   :  { %s544_s4 = scalar_lea.hbm %s674_s5, 256 }
 0x20b   :  { %p545_p1 = scmp.ne.s32.totalorder %s674_s5, %s544_s4  ;;  %p548_p2 = scmp.lt.u32.totalorder %s544_s4, %s674_s5 }
 0x20d   :  { %p550_p3 = pnand %p548_p2, %p545_p1 }
 0x20f   :  { %553 = shalt.err (!%p550_p3)
}
 0x210   :  { %281 = dma.vmem_to_hbm [thread:$0]  %s276_s10, 256, %s674_s5, [#allocation5], %s562_s30, %s562_s30, %s563_s6  }
 0x211   :  { %558 = dma.done.wait [#allocation5], 256  }
 0x212   :  { %559 = vsyncadd [#allocation5], 4294967040 }
 0x213   :  { %285 = vsyncpa [#allocation4], 1 }
 0x214   :  { %286 = vsyncpa [#allocation7], 1 }
 0x215   :  { %287 = vsyncpa [#allocation5], 1 }

</bundles_post_ra>
